<compile_context>
chip_gen: v5e
topology: v5e:2x2
jax: 0.10.0
libtpu: 0.0.40
codegen_flags: <defaults>
</compile_context>

<pallas_src>
import jax
import jax.numpy as jnp
from jax.experimental import pallas as pl
from jax.experimental.pallas import tpu as pltpu

_LANES = 128       # vreg lane width
_SUBLANES = 8      # f32 sublane count


def _linreg_kernel(p_ref, x_ref, o_ref):
    # p_ref: SMEM (2,) f32 scalars [w, b]; x_ref/o_ref: (block_rows, 128) VMEM tiles.
    w = p_ref[0]
    b = p_ref[1]
    o_ref[...] = (x_ref[...].astype(jnp.float32) * w + b).astype(o_ref.dtype)


def linear_regression(x, weight, bias, *, block_rows=1024):
    """x: (N, 1), weight: (1, 1), bias: (1,) -> (N, 1). Lane-dense tiled affine."""
    n, f = x.shape
    assert f == 1
    dtype = x.dtype

    # Pack parameters into a single flat SMEM-resident scalar array.
    params = jnp.concatenate(
        [weight.reshape(1), bias.reshape(1)]
    ).astype(jnp.float32)  # (2,)

    # Lane-dense reshape: N elements -> (rows_padded, 128), rows_padded a multiple
    # of the block size (itself a multiple of 8 sublanes).
    rows = pl.cdiv(n, _LANES)
    if rows <= block_rows:
        blk = max(_SUBLANES, ((rows + _SUBLANES - 1) // _SUBLANES) * _SUBLANES)
    else:
        blk = block_rows
    rows_padded = ((rows + blk - 1) // blk) * blk
    total = rows_padded * _LANES

    x_flat = x.reshape(-1)
    if total != n:
        x_flat = jnp.pad(x_flat, (0, total - n))
    x2d = x_flat.reshape(rows_padded, _LANES)

    grid = (rows_padded // blk,)

    out2d = pl.pallas_call(
        _linreg_kernel,
        out_shape=jax.ShapeDtypeStruct((rows_padded, _LANES), dtype),
        grid_spec=pltpu.PrefetchScalarGridSpec(
            num_scalar_prefetch=1,          # params -> SMEM, passed first to kernel
            grid=grid,
            in_specs=[
                pl.BlockSpec((blk, _LANES), lambda i, p: (i, 0)),
            ],
            out_specs=pl.BlockSpec((blk, _LANES), lambda i, p: (i, 0)),
        ),
        compiler_params=pltpu.CompilerParams(
            dimension_semantics=("parallel",),
        ),
    )(params, x2d)

    # Undo padding / lane packing.
    return out2d.reshape(-1)[:n].reshape(n, 1)


if __name__ == "__main__":
    key = jax.random.PRNGKey(0)
    kw, kb = jax.random.split(key)

    # nn.Linear(1, 1) init: U(-1/sqrt(fan_in), 1/sqrt(fan_in)), fan_in = 1.
    weight = jax.random.uniform(kw, (1, 1), jnp.float32, minval=-1.0, maxval=1.0)
    bias = jax.random.uniform(kb, (1,), jnp.float32, minval=-1.0, maxval=1.0)

    # Same input the reference script builds: linspace(-1, 1, 100) unsqueezed to (100, 1).
    x = jnp.linspace(-1.0, 1.0, 100, dtype=jnp.float32).reshape(100, 1)

    out = linear_regression(x, weight, bias)
    out = jax.block_until_ready(out)

    ref = x @ weight.T + bias
    assert out.shape == (100, 1)
    assert jnp.allclose(out, ref, atol=1e-6), "mismatch vs reference (N=100)"

    # Exercise the gridded (multi-tile) path as well with a larger N.
    x_big = jax.random.normal(jax.random.PRNGKey(1), (300_000, 1), jnp.float32)
    out_big = jax.block_until_ready(linear_regression(x_big, weight, bias))
    ref_big = x_big @ weight.T + bias
    assert out_big.shape == x_big.shape
    assert jnp.allclose(out_big, ref_big, atol=1e-5), "mismatch vs reference (large N)"

    print("KERNEL_OK")
</pallas_src>

<mosaic_0001>
module attributes {stable_mosaic.version = 11 : i64} {
  func.func @_linreg_kernel(%arg0: i32, %arg1: memref<2xf32, #tpu.memory_space<smem>>, %arg2: memref<8x128xf32, #tpu.memory_space<vmem>>, %arg3: memref<8x128xf32, #tpu.memory_space<vmem>>) attributes {dimension_semantics = [#tpu.dimension_semantics<parallel>], iteration_bounds = array<i64: 1>, scalar_prefetch = 1 : i64, scratch_operands = 0 : i64, tpu.core_type = #tpu.core_type<tc>, window_params = [{transform_indices = @transform_0, window_bounds = array<i64: 8, 128>}, {transform_indices = @transform_1, window_bounds = array<i64: 8, 128>}]} {
    %c0 = arith.constant 0 : index
    %0 = memref.load %arg1[%c0] : memref<2xf32, #tpu.memory_space<smem>>
    %c1 = arith.constant 1 : index
    %1 = memref.load %arg1[%c1] : memref<2xf32, #tpu.memory_space<smem>>
    %c0_0 = arith.constant 0 : index
    %c0_1 = arith.constant 0 : index
    %2 = vector.load %arg2[%c0_0, %c0_1] : memref<8x128xf32, #tpu.memory_space<vmem>>, vector<8x128xf32>
    %3 = vector.broadcast %0 : f32 to vector<8x128xf32>
    %4 = arith.mulf %2, %3 : vector<8x128xf32>
    %5 = vector.broadcast %1 : f32 to vector<8x128xf32>
    %6 = arith.addf %4, %5 : vector<8x128xf32>
    %c0_2 = arith.constant 0 : index
    %c0_3 = arith.constant 0 : index
    %7 = vector.load %arg3[%c0_2, %c0_3] : memref<8x128xf32, #tpu.memory_space<vmem>>, vector<8x128xf32>
    tpu.vector_store %arg3[%c0_2, %c0_3], %6 {strides = array<i32>} : memref<8x128xf32, #tpu.memory_space<vmem>>, vector<8x128xf32>,
    return
  }
  func.func @transform_0(%arg0: i32, %arg1: memref<2xf32, #tpu.memory_space<smem>>) -> (i32, i32) {
    %c0_i32 = arith.constant 0 : i32
    %c0_i32_0 = arith.constant 0 : i32
    return %arg0, %c0_i32 : i32, i32
  }
  func.func @transform_1(%arg0: i32, %arg1: memref<2xf32, #tpu.memory_space<smem>>) -> (i32, i32) {
    %c0_i32 = arith.constant 0 : i32
    %c0_i32_0 = arith.constant 0 : i32
    return %arg0, %c0_i32 : i32, i32
  }
}

</mosaic_0001>

<bundles_post_ra>
// kernel: tpu_custom_call.1
= control target key start
LH: loop header
LB: loop body
LE: loop exit
PB: predicated region body
PF: predicated region fallthrough
CT: control target
= control target key end

     0   :  { %s127_s12 = smov [#allocation3]   ;;  %s154_s0 = inlined_call_operand.hbm [shape: f32[2], index: 0, kind: input, shape index: {}]   ;;  %s155_s1 = inlined_call_operand.hbm [shape: f32[8,128], index: 1, kind: input, shape index: {}]   ;;  %s156_s2 = inlined_call_operand.hbm [shape: f32[8,128], index: 2, kind: output, shape index: {}]  }
   0x1   :  { %s8_s11 = sshll.u32 %s154_s0, 4  ;;  %s9_s11 = int_to_ptr.hbm [resolvable:$true] %s8_s11 }
   0x2   :  { %11 = dma.hbm_to_smem %s9_s11, 16, %s127_s12, [#allocation2] }
   0x3   :  { %121 = dma.done.wait [#allocation2], 16 }
   0x4   :  { %122 = vsyncadd [#allocation2], 4294967280 }
   0x5   :  { %14 = sfence }
   0x6   :  { %15 = vsyncpa [#allocation5], 0 }
   0x7   :  { %16 = vsyncpa [#allocation6], 0  ;;  %s22_s15 = sshll.u32 %s155_s1, 4  ;;  %s128_s16 = smov [#allocation4]   ;;  %s23_s15 = int_to_ptr.hbm [resolvable:$true] %s22_s15 }
   0x8   :  { %s24_s17 = sshll.u32 %s128_s16, 4  ;;  %s25_s17 = int_to_ptr.vmem [resolvable:$true] %s24_s17 }
   0x9   :  { %27 = dma.hbm_to_vmem [thread:$0]  %s23_s15, 128, %s25_s17, [#allocation5]  }
   0xa   :  { %123 = dma.done.wait [#allocation5], 128  }
   0xb   :  { %124 = vsyncadd [#allocation5], 4294967168  ;;  %s32_s0 = sld [smem:[#allocation3]]  ;;  %v34_v0 = vld [vmem:[#allocation4] sm:$0xff]  ;;  %s129_s19 = smov [#allocation7]  }
   0xc   :  { %s57_s18 = sld [smem:[#allocation3 + $0x1]]  ;;  %s45_s20 = sshll.u32 %s129_s19, 4  ;;  %s46_s20 = int_to_ptr.vmem [resolvable:$true] %s45_s20 }
   0xd   :  { %s47_s23 = sshll.u32 %s156_s2, 4  ;;  %s48_s23 = int_to_ptr.hbm [resolvable:$true] %s47_s23 }
  0x11   :  { %v35_v1 = vstv %s32_s0 }
  0x12   :  { %v36_v2 = vmul.f32 %v35_v1, %v34_v0  ;;  %v37_v3 = vstv %s57_s18 }
  0x14   :  { %v38_v4 = vadd.f32 %v37_v3, %v36_v2 }
  0x16   :  { %39 = vst [vmem:[#allocation7] sm:$0xff] %v38_v4 }
  0x17   :  { %50 = dma.vmem_to_hbm [thread:$0]  %s46_s20, 128, %s48_s23, [#allocation6]  }
  0x18   :  { %125 = dma.done.wait [#allocation6], 128  }
  0x19   :  { %126 = vsyncadd [#allocation6], 4294967168 }
  0x1a   :  { %55 = vsyncpa [#allocation5], 1 }
  0x1b   :  { %56 = vsyncpa [#allocation6], 1 }

</bundles_post_ra>
